<compile_context>
chip_gen: v6e
topology: v6e:2x2x1
jax: 0.10.0
libtpu: 0.0.40
codegen_flags: <defaults>
</compile_context>

<pallas_src>
import jax
import jax.numpy as jnp
from jax.experimental import pallas as pl
from jax.experimental.pallas import tpu as pltpu


def _round_up(x, m):
    return ((x + m - 1) // m) * m


def _vmem_budget():
    """(tile_budget_bytes, vmem_limit_bytes) derived from the chip's VMEM."""
    try:
        phys = int(pltpu.get_tpu_info().vmem_capacity_bytes)
    except Exception:
        phys = 64 * 1024 * 1024           # v7x per-TC physical; safe default
    tile_budget = max(8 << 20, min(48 << 20, (phys * 3) // 8))
    vmem_limit = min(phys - (8 << 20), tile_budget + (8 << 20))
    return tile_budget, vmem_limit


def _maybe_split_for_cores(n_batch, block, total, granule, bytes_per_unit):
    """Halve the spatial block once if the grid is too small to keep both v7x
    TensorCores busy, as long as each half still moves >= ~1 MiB."""
    n_blocks = pl.cdiv(total, block)
    if n_batch * n_blocks >= 4:
        return block, n_blocks
    half = _round_up((block + 1) // 2, granule)
    if 0 < half < block and half * bytes_per_unit >= (1 << 20):
        block = half
        n_blocks = pl.cdiv(total, block)
    return block, n_blocks


# ---------------------------------------------------------------------------
# Kernels
# ---------------------------------------------------------------------------

def _tail_vpu_kernel(w_ref, b_ref, h_ref, x_ref, o_ref):
    """Small-C path.  Spatial fills (sublane, lane) = (ts_sub, 128).

    h_ref/o_ref: (1, c_out, ts_sub, 128)   x_ref: (1, c_in, ts_sub, 128)
    w_ref: (c_out*c_in,) f32 SMEM          b_ref: (c_out,) f32 SMEM
    out[o] = h[o] + b[o] + sum_i w[o, i] * x[i]   (scalar-operand FMAs)
    """
    c_in = x_ref.shape[1]
    c_out = o_ref.shape[1]
    xf = [x_ref[0, i].astype(jnp.float32) for i in range(c_in)]
    for o in range(c_out):
        acc = h_ref[0, o].astype(jnp.float32) + b_ref[o]
        for i in range(c_in):
            acc = acc + w_ref[o * c_in + i] * xf[i]
        o_ref[0, o] = acc.astype(o_ref.dtype)


def _tail_mxu_kernel(h_ref, x_ref, w_ref, b_ref, o_ref):
    """Large-C path: channel mixing on the MXU (activation-dtype operands,
    f32 accumulate); residual + bias adds in f32 on the VPU.

    h_ref/o_ref: (1, c_out, ts)   x_ref: (1, c_in, ts)
    w_ref: (c_out, c_in) activation dtype   b_ref: (c_out, 1) f32
    """
    acc = jnp.dot(w_ref[...], x_ref[0], preferred_element_type=jnp.float32)
    acc = acc + h_ref[0].astype(jnp.float32) + b_ref[...]
    o_ref[0] = acc.astype(o_ref.dtype)


# ---------------------------------------------------------------------------
# Wrapper
# ---------------------------------------------------------------------------

def fused_resnet_tail(h, x, w, b):
    """ResnetBlock output path: h + Conv2d(c_in, c_out, 1)(x), NCHW in/out."""
    n, c_out, hh, ww = h.shape
    _, c_in, _, _ = x.shape
    assert x.shape == (n, c_in, hh, ww)
    assert w.shape == (c_out, c_in) and b.shape == (c_out,)

    out_dtype = h.dtype
    x = x.astype(out_dtype)
    itemsize = jnp.dtype(out_dtype).itemsize
    s = hh * ww

    tile_budget, vmem_limit = _vmem_budget()
    cost = pl.CostEstimate(
        flops=2 * n * s * c_out * (c_in + 1),
        transcendentals=0,
        bytes_accessed=n * s * (c_in + 2 * c_out) * itemsize
        + (c_out * c_in + c_out) * 4,
    )
    cparams = pltpu.CompilerParams(
        dimension_semantics=("parallel", "parallel"),
        vmem_limit_bytes=vmem_limit,
    )

    use_vpu = max(c_in, c_out) <= 8 and s % 128 == 0

    if use_vpu:
        # ---- tiny channel count: dense (sublane, lane) spatial slabs -------
        rows = s // 128
        x4 = x.reshape(n, c_in, rows, 128)          # free: contiguous reshape
        h4 = h.reshape(n, c_out, rows, 128)
        row_bytes = (c_in + 2 * c_out) * 128 * itemsize   # x+h read, out write
        max_rows = max(8, tile_budget // (2 * row_bytes))  # double-buffered
        ts_sub = rows if rows <= max_rows else (max_rows // 8) * 8
        ts_sub, n_blocks = _maybe_split_for_cores(n, ts_sub, rows, 8, row_bytes)

        out4 = pl.pallas_call(
            _tail_vpu_kernel,
            out_shape=jax.ShapeDtypeStruct((n, c_out, rows, 128), out_dtype),
            grid=(n, n_blocks),
            in_specs=[
                pl.BlockSpec(memory_space=pltpu.MemorySpace.SMEM),   # w (flat)
                pl.BlockSpec(memory_space=pltpu.MemorySpace.SMEM),   # b
                pl.BlockSpec((1, c_out, ts_sub, 128), lambda i, j: (i, 0, j, 0)),
                pl.BlockSpec((1, c_in, ts_sub, 128), lambda i, j: (i, 0, j, 0)),
            ],
            out_specs=pl.BlockSpec((1, c_out, ts_sub, 128),
                                   lambda i, j: (i, 0, j, 0)),
            compiler_params=cparams,
            cost_estimate=cost,
        )(w.astype(jnp.float32).reshape(-1), b.astype(jnp.float32), h4, x4)
        return out4.reshape(n, c_out, hh, ww)

    # ---- large channel count: MXU path, spatial on lanes --------------------
    x3 = x.reshape(n, c_in, s)
    h3 = h.reshape(n, c_out, s)
    lane_bytes = (c_in + 2 * c_out) * itemsize
    w_bytes = 2 * (c_out * c_in + c_out) * itemsize      # grid-invariant, 2 bufs
    avail = max(1 << 20, tile_budget - w_bytes)
    max_ts = avail // (2 * lane_bytes)                   # double-buffered tiles
    if s <= max_ts:
        ts = s                                           # full spatial per step
    else:
        # multiple of 256 keeps MXU columns unpadded on v6e/v7x (128 on v5e)
        ts = (max_ts // 256) * 256 if max_ts >= 256 else 128
    ts, n_blocks = _maybe_split_for_cores(n, ts, s, 256, lane_bytes)

    out3 = pl.pallas_call(
        _tail_mxu_kernel,
        out_shape=jax.ShapeDtypeStruct((n, c_out, s), out_dtype),
        grid=(n, n_blocks),
        in_specs=[
            pl.BlockSpec((1, c_out, ts), lambda i, j: (i, 0, j)),
            pl.BlockSpec((1, c_in, ts), lambda i, j: (i, 0, j)),
            # grid-invariant weight/bias (footprint accounted in tile budget)
            pl.BlockSpec((c_out, c_in), lambda i, j: (0, 0)),
            pl.BlockSpec((c_out, 1), lambda i, j: (0, 0)),
        ],
        out_specs=pl.BlockSpec((1, c_out, ts), lambda i, j: (i, 0, j)),
        compiler_params=cparams,
        cost_estimate=cost,
    )(h3, x3, w.astype(out_dtype), b.astype(jnp.float32).reshape(c_out, 1))
    return out3.reshape(n, c_out, hh, ww)


if __name__ == "__main__":
    key = jax.random.PRNGKey(0)
    k1, k2, k3, k4, k5, k6, k7, k8 = jax.random.split(key, 8)

    # Case 1 — small-C VPU path (f32): ResnetBlock tail with dim == dim_out.
    N, C, H, W = 2, 4, 16, 16
    x1 = jax.random.normal(k1, (N, C, H, W), jnp.float32)
    h1 = jax.random.normal(k2, (N, C, H, W), jnp.float32)
    w1 = jax.random.normal(k3, (C, C), jnp.float32) * 0.1
    b1 = jax.random.normal(k4, (C,), jnp.float32) * 0.1

    out1 = jax.block_until_ready(jax.jit(fused_resnet_tail)(h1, x1, w1, b1))
    ref1 = (h1
            + jnp.einsum("oi,nihw->nohw", w1, x1,
                         precision=jax.lax.Precision.HIGHEST)
            + b1[None, :, None, None])
    assert out1.shape == ref1.shape and out1.dtype == h1.dtype
    assert jnp.allclose(out1, ref1, atol=1e-5, rtol=1e-5)

    # Case 2 — MXU path (bf16 activations, f32 accumulate): dim != dim_out.
    Ci, Co = 32, 16
    x2 = jax.random.normal(k5, (N, Ci, H, W), jnp.float32).astype(jnp.bfloat16)
    h2 = jax.random.normal(k6, (N, Co, H, W), jnp.float32).astype(jnp.bfloat16)
    w2 = jax.random.normal(k7, (Co, Ci), jnp.float32) * 0.1
    b2 = jax.random.normal(k8, (Co,), jnp.float32) * 0.1

    out2 = jax.block_until_ready(jax.jit(fused_resnet_tail)(h2, x2, w2, b2))
    w2_eff = w2.astype(jnp.bfloat16).astype(jnp.float32)   # what the kernel sees
    ref2 = (h2.astype(jnp.float32)
            + jnp.einsum("oi,nihw->nohw", w2_eff, x2.astype(jnp.float32),
                         precision=jax.lax.Precision.HIGHEST)
            + b2[None, :, None, None])
    assert out2.shape == ref2.shape and out2.dtype == jnp.bfloat16
    assert jnp.allclose(out2.astype(jnp.float32), ref2, atol=5e-2, rtol=5e-2)

    print("KERNEL_OK")
</pallas_src>

<mosaic_0001>
module attributes {stable_mosaic.version = 11 : i64} {
  func.func @_tail_vpu_kernel(%arg0: i32, %arg1: i32, %arg2: memref<16xf32, #tpu.memory_space<smem>>, %arg3: memref<4xf32, #tpu.memory_space<smem>>, %arg4: memref<1x4x2x128xf32, #tpu.memory_space<vmem>>, %arg5: memref<1x4x2x128xf32, #tpu.memory_space<vmem>>, %arg6: memref<1x4x2x128xf32, #tpu.memory_space<vmem>>) attributes {dimension_semantics = [#tpu.dimension_semantics<parallel>, #tpu.dimension_semantics<parallel>], iteration_bounds = array<i64: 2, 1>, scalar_prefetch = 0 : i64, scratch_operands = 0 : i64, tpu.core_type = #tpu.core_type<tc>, window_params = [{transform_indices = @transform_0, window_bounds = array<i64: 16>}, {transform_indices = @transform_1, window_bounds = array<i64: 4>}, {transform_indices = @transform_2, window_bounds = array<i64: 1, 4, 2, 128>}, {transform_indices = @transform_3, window_bounds = array<i64: 1, 4, 2, 128>}, {transform_indices = @transform_4, window_bounds = array<i64: 1, 4, 2, 128>}]} {
    %c0 = arith.constant 0 : index
    %c0_0 = arith.constant 0 : index
    %c0_1 = arith.constant 0 : index
    %c0_2 = arith.constant 0 : index
    %0 = vector.load %arg5[%c0, %c0_0, %c0_1, %c0_2] : memref<1x4x2x128xf32, #tpu.memory_space<vmem>>, vector<1x1x2x128xf32>
    %1 = vector.shape_cast %0 : vector<1x1x2x128xf32> to vector<2x128xf32>
    %c0_3 = arith.constant 0 : index
    %c1 = arith.constant 1 : index
    %c0_4 = arith.constant 0 : index
    %c0_5 = arith.constant 0 : index
    %2 = vector.load %arg5[%c0_3, %c1, %c0_4, %c0_5] : memref<1x4x2x128xf32, #tpu.memory_space<vmem>>, vector<1x1x2x128xf32>
    %3 = vector.shape_cast %2 : vector<1x1x2x128xf32> to vector<2x128xf32>
    %c0_6 = arith.constant 0 : index
    %c2 = arith.constant 2 : index
    %c0_7 = arith.constant 0 : index
    %c0_8 = arith.constant 0 : index
    %4 = vector.load %arg5[%c0_6, %c2, %c0_7, %c0_8] : memref<1x4x2x128xf32, #tpu.memory_space<vmem>>, vector<1x1x2x128xf32>
    %5 = vector.shape_cast %4 : vector<1x1x2x128xf32> to vector<2x128xf32>
    %c0_9 = arith.constant 0 : index
    %c3 = arith.constant 3 : index
    %c0_10 = arith.constant 0 : index
    %c0_11 = arith.constant 0 : index
    %6 = vector.load %arg5[%c0_9, %c3, %c0_10, %c0_11] : memref<1x4x2x128xf32, #tpu.memory_space<vmem>>, vector<1x1x2x128xf32>
    %7 = vector.shape_cast %6 : vector<1x1x2x128xf32> to vector<2x128xf32>
    %c0_12 = arith.constant 0 : index
    %c0_13 = arith.constant 0 : index
    %c0_14 = arith.constant 0 : index
    %c0_15 = arith.constant 0 : index
    %8 = vector.load %arg4[%c0_12, %c0_13, %c0_14, %c0_15] : memref<1x4x2x128xf32, #tpu.memory_space<vmem>>, vector<1x1x2x128xf32>
    %9 = vector.shape_cast %8 : vector<1x1x2x128xf32> to vector<2x128xf32>
    %c0_16 = arith.constant 0 : index
    %10 = memref.load %arg3[%c0_16] : memref<4xf32, #tpu.memory_space<smem>>
    %11 = vector.broadcast %10 : f32 to vector<2x128xf32>
    %12 = arith.addf %9, %11 : vector<2x128xf32>
    %c0_17 = arith.constant 0 : index
    %13 = memref.load %arg2[%c0_17] : memref<16xf32, #tpu.memory_space<smem>>
    %14 = vector.broadcast %13 : f32 to vector<2x128xf32>
    %15 = arith.mulf %14, %1 : vector<2x128xf32>
    %16 = arith.addf %12, %15 : vector<2x128xf32>
    %c1_18 = arith.constant 1 : index
    %17 = memref.load %arg2[%c1_18] : memref<16xf32, #tpu.memory_space<smem>>
    %18 = vector.broadcast %17 : f32 to vector<2x128xf32>
    %19 = arith.mulf %18, %3 : vector<2x128xf32>
    %20 = arith.addf %16, %19 : vector<2x128xf32>
    %c2_19 = arith.constant 2 : index
    %21 = memref.load %arg2[%c2_19] : memref<16xf32, #tpu.memory_space<smem>>
    %22 = vector.broadcast %21 : f32 to vector<2x128xf32>
    %23 = arith.mulf %22, %5 : vector<2x128xf32>
    %24 = arith.addf %20, %23 : vector<2x128xf32>
    %c3_20 = arith.constant 3 : index
    %25 = memref.load %arg2[%c3_20] : memref<16xf32, #tpu.memory_space<smem>>
    %26 = vector.broadcast %25 : f32 to vector<2x128xf32>
    %27 = arith.mulf %26, %7 : vector<2x128xf32>
    %28 = arith.addf %24, %27 : vector<2x128xf32>
    %c0_21 = arith.constant 0 : index
    %c0_22 = arith.constant 0 : index
    %c0_23 = arith.constant 0 : index
    %c0_24 = arith.constant 0 : index
    %29 = vector.load %arg6[%c0_21, %c0_22, %c0_23, %c0_24] : memref<1x4x2x128xf32, #tpu.memory_space<vmem>>, vector<1x1x2x128xf32>
    %30 = vector.shape_cast %29 : vector<1x1x2x128xf32> to vector<2x128xf32>
    %31 = vector.shape_cast %28 : vector<2x128xf32> to vector<1x1x2x128xf32>
    tpu.vector_store %arg6[%c0_21, %c0_22, %c0_23, %c0_24], %31 {strides = array<i32>} : memref<1x4x2x128xf32, #tpu.memory_space<vmem>>, vector<1x1x2x128xf32>,
    %c0_25 = arith.constant 0 : index
    %c1_26 = arith.constant 1 : index
    %c0_27 = arith.constant 0 : index
    %c0_28 = arith.constant 0 : index
    %32 = vector.load %arg4[%c0_25, %c1_26, %c0_27, %c0_28] : memref<1x4x2x128xf32, #tpu.memory_space<vmem>>, vector<1x1x2x128xf32>
    %33 = vector.shape_cast %32 : vector<1x1x2x128xf32> to vector<2x128xf32>
    %c1_29 = arith.constant 1 : index
    %34 = memref.load %arg3[%c1_29] : memref<4xf32, #tpu.memory_space<smem>>
    %35 = vector.broadcast %34 : f32 to vector<2x128xf32>
    %36 = arith.addf %33, %35 : vector<2x128xf32>
    %c4 = arith.constant 4 : index
    %37 = memref.load %arg2[%c4] : memref<16xf32, #tpu.memory_space<smem>>
    %38 = vector.broadcast %37 : f32 to vector<2x128xf32>
    %39 = arith.mulf %38, %1 : vector<2x128xf32>
    %40 = arith.addf %36, %39 : vector<2x128xf32>
    %c5 = arith.constant 5 : index
    %41 = memref.load %arg2[%c5] : memref<16xf32, #tpu.memory_space<smem>>
    %42 = vector.broadcast %41 : f32 to vector<2x128xf32>
    %43 = arith.mulf %42, %3 : vector<2x128xf32>
    %44 = arith.addf %40, %43 : vector<2x128xf32>
    %c6 = arith.constant 6 : index
    %45 = memref.load %arg2[%c6] : memref<16xf32, #tpu.memory_space<smem>>
    %46 = vector.broadcast %45 : f32 to vector<2x128xf32>
    %47 = arith.mulf %46, %5 : vector<2x128xf32>
    %48 = arith.addf %44, %47 : vector<2x128xf32>
    %c7 = arith.constant 7 : index
    %49 = memref.load %arg2[%c7] : memref<16xf32, #tpu.memory_space<smem>>
    %50 = vector.broadcast %49 : f32 to vector<2x128xf32>
    %51 = arith.mulf %50, %7 : vector<2x128xf32>
    %52 = arith.addf %48, %51 : vector<2x128xf32>
    %c0_30 = arith.constant 0 : index
    %c1_31 = arith.constant 1 : index
    %c0_32 = arith.constant 0 : index
    %c0_33 = arith.constant 0 : index
    %53 = vector.load %arg6[%c0_30, %c1_31, %c0_32, %c0_33] : memref<1x4x2x128xf32, #tpu.memory_space<vmem>>, vector<1x1x2x128xf32>
    %54 = vector.shape_cast %53 : vector<1x1x2x128xf32> to vector<2x128xf32>
    %55 = vector.shape_cast %52 : vector<2x128xf32> to vector<1x1x2x128xf32>
    tpu.vector_store %arg6[%c0_30, %c1_31, %c0_32, %c0_33], %55 {strides = array<i32>} : memref<1x4x2x128xf32, #tpu.memory_space<vmem>>, vector<1x1x2x128xf32>,
    %c0_34 = arith.constant 0 : index
    %c2_35 = arith.constant 2 : index
    %c0_36 = arith.constant 0 : index
    %c0_37 = arith.constant 0 : index
    %56 = vector.load %arg4[%c0_34, %c2_35, %c0_36, %c0_37] : memref<1x4x2x128xf32, #tpu.memory_space<vmem>>, vector<1x1x2x128xf32>
    %57 = vector.shape_cast %56 : vector<1x1x2x128xf32> to vector<2x128xf32>
    %c2_38 = arith.constant 2 : index
    %58 = memref.load %arg3[%c2_38] : memref<4xf32, #tpu.memory_space<smem>>
    %59 = vector.broadcast %58 : f32 to vector<2x128xf32>
    %60 = arith.addf %57, %59 : vector<2x128xf32>
    %c8 = arith.constant 8 : index
    %61 = memref.load %arg2[%c8] : memref<16xf32, #tpu.memory_space<smem>>
    %62 = vector.broadcast %61 : f32 to vector<2x128xf32>
    %63 = arith.mulf %62, %1 : vector<2x128xf32>
    %64 = arith.addf %60, %63 : vector<2x128xf32>
    %c9 = arith.constant 9 : index
    %65 = memref.load %arg2[%c9] : memref<16xf32, #tpu.memory_space<smem>>
    %66 = vector.broadcast %65 : f32 to vector<2x128xf32>
    %67 = arith.mulf %66, %3 : vector<2x128xf32>
    %68 = arith.addf %64, %67 : vector<2x128xf32>
    %c10 = arith.constant 10 : index
    %69 = memref.load %arg2[%c10] : memref<16xf32, #tpu.memory_space<smem>>
    %70 = vector.broadcast %69 : f32 to vector<2x128xf32>
    %71 = arith.mulf %70, %5 : vector<2x128xf32>
    %72 = arith.addf %68, %71 : vector<2x128xf32>
    %c11 = arith.constant 11 : index
    %73 = memref.load %arg2[%c11] : memref<16xf32, #tpu.memory_space<smem>>
    %74 = vector.broadcast %73 : f32 to vector<2x128xf32>
    %75 = arith.mulf %74, %7 : vector<2x128xf32>
    %76 = arith.addf %72, %75 : vector<2x128xf32>
    %c0_39 = arith.constant 0 : index
    %c2_40 = arith.constant 2 : index
    %c0_41 = arith.constant 0 : index
    %c0_42 = arith.constant 0 : index
    %77 = vector.load %arg6[%c0_39, %c2_40, %c0_41, %c0_42] : memref<1x4x2x128xf32, #tpu.memory_space<vmem>>, vector<1x1x2x128xf32>
    %78 = vector.shape_cast %77 : vector<1x1x2x128xf32> to vector<2x128xf32>
    %79 = vector.shape_cast %76 : vector<2x128xf32> to vector<1x1x2x128xf32>
    tpu.vector_store %arg6[%c0_39, %c2_40, %c0_41, %c0_42], %79 {strides = array<i32>} : memref<1x4x2x128xf32, #tpu.memory_space<vmem>>, vector<1x1x2x128xf32>,
    %c0_43 = arith.constant 0 : index
    %c3_44 = arith.constant 3 : index
    %c0_45 = arith.constant 0 : index
    %c0_46 = arith.constant 0 : index
    %80 = vector.load %arg4[%c0_43, %c3_44, %c0_45, %c0_46] : memref<1x4x2x128xf32, #tpu.memory_space<vmem>>, vector<1x1x2x128xf32>
    %81 = vector.shape_cast %80 : vector<1x1x2x128xf32> to vector<2x128xf32>
    %c3_47 = arith.constant 3 : index
    %82 = memref.load %arg3[%c3_47] : memref<4xf32, #tpu.memory_space<smem>>
    %83 = vector.broadcast %82 : f32 to vector<2x128xf32>
    %84 = arith.addf %81, %83 : vector<2x128xf32>
    %c12 = arith.constant 12 : index
    %85 = memref.load %arg2[%c12] : memref<16xf32, #tpu.memory_space<smem>>
    %86 = vector.broadcast %85 : f32 to vector<2x128xf32>
    %87 = arith.mulf %86, %1 : vector<2x128xf32>
    %88 = arith.addf %84, %87 : vector<2x128xf32>
    %c13 = arith.constant 13 : index
    %89 = memref.load %arg2[%c13] : memref<16xf32, #tpu.memory_space<smem>>
    %90 = vector.broadcast %89 : f32 to vector<2x128xf32>
    %91 = arith.mulf %90, %3 : vector<2x128xf32>
    %92 = arith.addf %88, %91 : vector<2x128xf32>
    %c14 = arith.constant 14 : index
    %93 = memref.load %arg2[%c14] : memref<16xf32, #tpu.memory_space<smem>>
    %94 = vector.broadcast %93 : f32 to vector<2x128xf32>
    %95 = arith.mulf %94, %5 : vector<2x128xf32>
    %96 = arith.addf %92, %95 : vector<2x128xf32>
    %c15 = arith.constant 15 : index
    %97 = memref.load %arg2[%c15] : memref<16xf32, #tpu.memory_space<smem>>
    %98 = vector.broadcast %97 : f32 to vector<2x128xf32>
    %99 = arith.mulf %98, %7 : vector<2x128xf32>
    %100 = arith.addf %96, %99 : vector<2x128xf32>
    %c0_48 = arith.constant 0 : index
    %c3_49 = arith.constant 3 : index
    %c0_50 = arith.constant 0 : index
    %c0_51 = arith.constant 0 : index
    %101 = vector.load %arg6[%c0_48, %c3_49, %c0_50, %c0_51] : memref<1x4x2x128xf32, #tpu.memory_space<vmem>>, vector<1x1x2x128xf32>
    %102 = vector.shape_cast %101 : vector<1x1x2x128xf32> to vector<2x128xf32>
    %103 = vector.shape_cast %100 : vector<2x128xf32> to vector<1x1x2x128xf32>
    tpu.vector_store %arg6[%c0_48, %c3_49, %c0_50, %c0_51], %103 {strides = array<i32>} : memref<1x4x2x128xf32, #tpu.memory_space<vmem>>, vector<1x1x2x128xf32>,
    return
  }
  func.func @transform_0(%arg0: i32, %arg1: i32) -> i32 {
    %c0_i32 = arith.constant 0 : i32
    %c0_i32_0 = arith.constant 0 : i32
    return %c0_i32 : i32
  }
  func.func @transform_1(%arg0: i32, %arg1: i32) -> i32 {
    %c0_i32 = arith.constant 0 : i32
    %c0_i32_0 = arith.constant 0 : i32
    return %c0_i32 : i32
  }
  func.func @transform_2(%arg0: i32, %arg1: i32) -> (i32, i32, i32, i32) {
    %c0_i32 = arith.constant 0 : i32
    %c0_i32_0 = arith.constant 0 : i32
    %c0_i32_1 = arith.constant 0 : i32
    return %arg0, %c0_i32, %arg1, %c0_i32_0 : i32, i32, i32, i32
  }
  func.func @transform_3(%arg0: i32, %arg1: i32) -> (i32, i32, i32, i32) {
    %c0_i32 = arith.constant 0 : i32
    %c0_i32_0 = arith.constant 0 : i32
    %c0_i32_1 = arith.constant 0 : i32
    return %arg0, %c0_i32, %arg1, %c0_i32_0 : i32, i32, i32, i32
  }
  func.func @transform_4(%arg0: i32, %arg1: i32) -> (i32, i32, i32, i32) {
    %c0_i32 = arith.constant 0 : i32
    %c0_i32_0 = arith.constant 0 : i32
    %c0_i32_1 = arith.constant 0 : i32
    return %arg0, %c0_i32, %arg1, %c0_i32_0 : i32, i32, i32, i32
  }
}

</mosaic_0001>

<bundles_post_ra>
// kernel: fused_resnet_tail.1
= control target key start
LH: loop header
LB: loop body
LE: loop exit
PB: predicated region body
PF: predicated region fallthrough
CT: control target
= control target key end

     0   :  { %9 = vsyncpa [#allocation3], 0  ;;  %s809_s0 = inlined_call_operand.vmem [shape: f32[16], index: 0, kind: input, shape index: {}]   ;;  %s810_s1 = inlined_call_operand.vmem [shape: f32[4], index: 1, kind: input, shape index: {}]   ;;  %s811_s2 = inlined_call_operand.vmem [shape: f32[2,4,2,128], index: 2, kind: input, shape index: {}]   ;;  %s812_s3 = inlined_call_operand.vmem [shape: f32[2,4,2,128], index: 3, kind: input, shape index: {}]   ;;  %s813_s4 = inlined_call_operand.vmem [shape: f32[2,4,2,128], index: 4, kind: output, shape index: {}]  }
   0x1   :  { %10 = vsyncpa [#allocation5], 0  ;;  %s689_s15 = smov 0   ;;  %s691_s16 = smov 0  }
   0x2   :  { %s693_s17 = smov 0  }
   0x3 LB: > { %s508_s18 = sadd.s32 4294967295, %s660_s17   ;;  %s28_s19 = sadd.s32 1, %s656_s16  ;;  %s660_s17 = sphi %s693_s17, %s16_s17   ;;  %s656_s16 = sphi %s691_s16, %s823_s16   ;;  %s652_s15 = sphi %s689_s15, %s822_s15  }
   0x4   : > { %p30_p0 = scmp.ge.s32.totalorder %s28_s19, 2  ;;  %p510_p1 = scmp.ge.s32.totalorder %s660_s17, 1 }
   0x5   : > { %p159_p2 = scmp.lt.s32.totalorder %s660_s17, 3  ;;  %p714_p4 = scmp.eq.s32.totalorder %s508_s18, 0 }
   0x6   : > { %s825_s19 = smov (%p30_p0, %s28_s19), 0  ;;  %s172_s24 = sshll.u32 %s809_s0, 4  ;;  %s173_s24 = int_to_ptr.vmem [resolvable:$true] %s172_s24 }
   0x7   : > { %p710_p3 = pnand %p510_p1, %p159_p2  ;;  %s183_s27 = sshll.u32 %s810_s1, 4  ;;  %s184_s27 = int_to_ptr.vmem [resolvable:$true] %s183_s27 }
   0x8   : > { %s818_s21 = scalar_select %p714_p4, 1, 0 }
   0x9   : > { %s817_s20 = scalar_select %p710_p3, 1, 0 }
   0xa   : > { %p563_p5 = pneg %p710_p3  ;;  %s600_s29 = scalar_lea.vmem %s173_s24, 16 }
   0xb   : > { %p601_p7 = scmp.ne.s32.totalorder %s173_s24, %s600_s29  ;;  %p608_p11 = scmp.lt.s32.totalorder %s173_s24, %s173_s24 }
   0xc   : > { %p728_p6 = pnand %p714_p4, %p563_p5  ;;  %p609_p12 = scmp.lt.s32.totalorder %s600_s29, %s600_s29 }
   0xe   : > { %p602_p8 = pneg %p728_p6  ;;  %p610_p13 = por %p609_p12, %p608_p11 }
  0x10   : > { %p603_p9 = pnand %p602_p8, %p601_p7 }
  0x12   : > { %p604_p10 = pneg %p603_p9 }
  0x14   : > { %p611_p0 = pnand %p610_p13, %p604_p10 }
  0x16   : > { %614 = shalt.err (!%p611_p0)
}
  0x17   : > { %s662_s30 = smov [#allocation2]   ;;  %s615_s5 = scalar_lea.vmem %s184_s27, 16 }
  0x18   : > { %566 = dma.vmem_to_smem (!%p728_p6), %s173_s24, 16, %s662_s30, [#allocation3]  }
  0x19   : > { %p616_p1 = scmp.ne.s32.totalorder %s184_s27, %s615_s5  ;;  %p623_p4 = scmp.lt.s32.totalorder %s184_s27, %s184_s27 }
  0x1a   : > { %p624_p3 = scmp.lt.s32.totalorder %s615_s5, %s615_s5 }
  0x1b   : > { %p618_p2 = pnand %p616_p1, %p602_p8 }
  0x1c   : > { %p625_p7 = por %p624_p3, %p623_p4 }
  0x1d   : > { %p619_p5 = pneg %p618_p2 }
  0x1f   : > { %p626_p9 = pnand %p625_p7, %p619_p5 }
  0x21   : > { %629 = shalt.err (!%p626_p9)
}
  0x22   : > { %s663_s6 = smov [#allocation4]   ;;  %p820_p10 = scmp.ne.s32.totalorder %s817_s20, 0 }
  0x23   : > { %569 = dma.vmem_to_smem (!%p728_p6), %s184_s27, 16, %s663_s6, [#allocation5]  }
  0x24   : > { %218 = sbr.rel (%p820_p10) target bundleno = 81 (0x51), region = 36  ;;  %p821_p11 = scmp.ne.s32.totalorder (!%p820_p10), %s818_s21, 0 }
  0x29   : > { %643 = dma.done.wait (%p821_p11), [#allocation3], 16  }
  0x2a   : > { %645 = vsyncadd (%p821_p11), [#allocation3], 4294967280 }
  0x2b   : > { %647 = dma.done.wait (%p821_p11), [#allocation5], 16  }
  0x2c   : > { %649 = vsyncadd (%p821_p11), [#allocation5], 4294967280 }
  0x2d   : > { %228 = sfence }
  0x2e   : > { %p263_p3 = scmp.lt.s32.totalorder %s652_s15, 1  ;;  %s295_s7 = sld [smem:[#allocation4]] }
  0x2f   : > { %s298_s8 = sld [smem:[#allocation2]] }
  0x30   : > { %s827_s15 = smov (!%p263_p3, %s652_s15), 1  ;;  %s526_s9 = sld [smem:[#allocation2 + $0x1]] }
  0x31   : > { %s750_s10 = sshll.u32 %s827_s15, 3  ;;  %s527_s11 = sld [smem:[#allocation2 + $0x2]] }
  0x32   : > { %s756_s14 = scalar_lea.vmem %s811_s2, %s750_s10  ;;  %s278_s21 = scalar_lea.vmem %s812_s3, %s750_s10 }
  0x33   : > { %v762_v0 = vld [vmem:[%s278_s21] sm:$0x3]  ;;  %v764_v2 = vld [vmem:[%s278_s21 + $0x2] sm:$0x3]  ;;  %s528_s15 = sld [smem:[#allocation2 + $0x3]]  ;;  %s780_s5 = scalar_lea.vmem %s813_s4, %s750_s10 }
  0x34   : > { %v296_v1 = vstv %s295_s7  ;;  %v294_v3 = vld [vmem:[%s756_s14] sm:$0x3]  ;;  %v767_v5 = vld [vmem:[%s278_s21 + $0x4] sm:$0x3]  ;;  %s530_s22 = sld [smem:[#allocation4 + $0x1]] }
  0x35   : > { %v299_v4 = vstv %s298_s8  ;;  %v297_v6 = vadd.f32 %v296_v1, %v294_v3  ;;  %s531_s23 = sld [smem:[#allocation2 + $0x4]]  ;;  %v771_v12 = vld [vmem:[%s278_s21 + $0x6] sm:$0x3]  ;;  %v529_v15 = vld [vmem:[%s756_s14 + $0x2] sm:$0x3] }
  0x36   : > { %v300_v7 = vmul.f32 %v299_v4, %v762_v0  ;;  %v303_v8 = vstv %s526_s9  ;;  %s532_s24 = sld [smem:[#allocation2 + $0x5]]  ;;  %v536_v27 = vld [vmem:[%s756_s14 + $0x4] sm:$0x3]  ;;  %v543_v41 = vld [vmem:[%s756_s14 + $0x6] sm:$0x3] }
  0x37   : > { %v304_v10 = vmul.f32 %v764_v2, %v303_v8  ;;  %v307_v11 = vstv %s527_s11  ;;  %s533_s25 = sld [smem:[#allocation2 + $0x6]] }
  0x38   : > { %v301_v9 = vadd.f32 %v300_v7, %v297_v6  ;;  %v308_v13 = vmul.f32 %v767_v5, %v307_v11  ;;  %s534_s26 = sld [smem:[#allocation2 + $0x7]] }
  0x39   : > { %v311_v16 = vstv %s528_s15  ;;  %s537_s27 = sld [smem:[#allocation4 + $0x2]] }
  0x3a   : > { %v305_v14 = vadd.f32 %v304_v10, %v301_v9  ;;  %v312_v18 = vmul.f32 %v771_v12, %v311_v16  ;;  %v318_v19 = vstv %s530_s22  ;;  %s538_s28 = sld [smem:[#allocation2 + $0x8]] }
  0x3b   : > { %v319_v20 = vadd.f32 %v529_v15, %v318_v19  ;;  %v321_v21 = vstv %s531_s23  ;;  %s539_s6 = sld [smem:[#allocation2 + $0x9]] }
  0x3c   : > { %v309_v17 = vadd.f32 %v308_v13, %v305_v14  ;;  %v322_v23 = vmul.f32 %v321_v21, %v762_v0  ;;  %v325_v24 = vstv %s532_s24  ;;  %s540_s7 = sld [smem:[#allocation2 + $0xa]] }
  0x3d   : > { %v326_v25 = vmul.f32 %v764_v2, %v325_v24  ;;  %v329_v26 = vstv %s533_s25  ;;  %s541_s8 = sld [smem:[#allocation2 + $0xb]] }
  0x3e   : > { %v313_v22 = vadd.f32 %v312_v18, %v309_v17  ;;  %v323_v28 = vadd.f32 %v322_v23, %v319_v20  ;;  %v330_v29 = vmul.f32 %v767_v5, %v329_v26  ;;  %v333_v30 = vstv %s534_s26  ;;  %s544_s9 = sld [smem:[#allocation4 + $0x3]] }
  0x3f   : > { %v341_v31 = vstv %s537_s27  ;;  %s545_s10 = sld [smem:[#allocation2 + $0xc]]  ;;  %v334_v33 = vmul.f32 %v771_v12, %v333_v30 }
  0x40   : > { %314 = vst [vmem:[%s780_s5] sm:$0x3] %v313_v22  ;;  %v327_v32 = vadd.f32 %v326_v25, %v323_v28  ;;  %v342_v34 = vadd.f32 %v536_v27, %v341_v31  ;;  %v344_v35 = vstv %s538_s28  ;;  %s546_s11 = sld [smem:[#allocation2 + $0xd]] }
  0x41   : > { %v345_v36 = vmul.f32 %v344_v35, %v762_v0  ;;  %v348_v37 = vstv %s539_s6  ;;  %s547_s12 = sld [smem:[#allocation2 + $0xe]] }
  0x42   : > { %v331_v38 = vadd.f32 %v330_v29, %v327_v32  ;;  %v349_v39 = vmul.f32 %v764_v2, %v348_v37  ;;  %v352_v40 = vstv %s540_s7  ;;  %s548_s13 = sld [smem:[#allocation2 + $0xf]] }
  0x43   : > { %v346_v42 = vadd.f32 %v345_v36, %v342_v34  ;;  %v353_v43 = vmul.f32 %v767_v5, %v352_v40  ;;  %v356_v44 = vstv %s541_s8 }
  0x44   : > { %v335_v45 = vadd.f32 %v334_v33, %v331_v38  ;;  %v364_v46 = vstv %s544_s9  ;;  %v357_v48 = vmul.f32 %v771_v12, %v356_v44 }
  0x45   : > { %v350_v47 = vadd.f32 %v349_v39, %v346_v42  ;;  %v365_v49 = vadd.f32 %v543_v41, %v364_v46  ;;  %v367_v50 = vstv %s545_s10 }
  0x46   : > { %535 = vst [vmem:[%s780_s5 + $0x2] sm:$0x3] %v335_v45  ;;  %v368_v51 = vmul.f32 %v367_v50, %v762_v0  ;;  %v371_v52 = vstv %s546_s11 }
  0x47   : > { %v354_v53 = vadd.f32 %v353_v43, %v350_v47  ;;  %v372_v54 = vmul.f32 %v764_v2, %v371_v52  ;;  %v375_v55 = vstv %s547_s12 }
  0x48   : > { %v369_v56 = vadd.f32 %v368_v51, %v365_v49  ;;  %v376_v57 = vmul.f32 %v767_v5, %v375_v55  ;;  %v379_v58 = vstv %s548_s13 }
  0x49   : > { %v358_v59 = vadd.f32 %v357_v48, %v354_v53  ;;  %v380_v61 = vmul.f32 %v771_v12, %v379_v58 }
  0x4a   : > { %v373_v60 = vadd.f32 %v372_v54, %v369_v56 }
  0x4b   : > { %542 = vst [vmem:[%s780_s5 + $0x4] sm:$0x3] %v358_v59 }
  0x4c   : > { %v377_v62 = vadd.f32 %v376_v57, %v373_v60 }
  0x4e   : > { %v381_v63 = vadd.f32 %v380_v61, %v377_v62 }
  0x50   : > { %549 = vst [vmem:[%s780_s5 + $0x6] sm:$0x3] %v381_v63 }
  0x51 PF: > { %s16_s17 = sadd.s32 1, %s660_s17   ;;  %s822_s15 = smov %s656_s16 }
  0x52   : > { %p13_p4 = scmp.ge.s32.totalorder %s16_s17, 4   ;;  %s823_s16 = smov %s825_s19 }
  0x54   :  { %15 = sbr.rel (!%p13_p4) target bundleno = 3 (0x3), region = 87 }
  0x59   :  { %411 = vsyncpa [#allocation3], 1 }
  0x5a   :  { %413 = vsyncpa [#allocation3 + $0x1], 1 }
  0x5b   :  { %414 = vsyncpa [#allocation5], 1 }

</bundles_post_ra>
